<compile_context>
chip_gen: v5e
topology: v5e:2x2
jax: 0.10.0
libtpu: 0.0.40
codegen_flags: <defaults>
</compile_context>

<pallas_src>
import jax
import jax.numpy as jnp
from jax.experimental import pallas as pl
from jax.experimental.pallas import tpu as pltpu


def customnet_kernel(xt_ref, w1t_ref, b1_ref, wout_ref, b2_ref, o_ref):
    xt = xt_ref[...]                                    # (p, T) lane-dense tile
    # Hidden layer (scale W already folded into w1t): (hidden, p) @ (p, T)
    h = jnp.dot(w1t_ref[...], xt,
                preferred_element_type=jnp.float32) + b1_ref[...]
    h = jnp.maximum(h, 0.0)                             # (hidden, T)
    # Fused output layer + skip: [W2^T | theta^T] @ [h ; x] + b2
    hx = jnp.concatenate([h, xt], axis=0)               # (hidden + p, T)
    o_ref[...] = jnp.dot(wout_ref[...], hx,
                         preferred_element_type=jnp.float32) + b2_ref[0]


def customnet_forward(x, W, theta, W1, b1, W2, b2, *, tile_n=8192):
    N, p = x.shape
    hidden = W1.shape[1]
    lane = 128

    # Tile size: multiple of 128, no bigger than the (lane-padded) batch.
    tile_n = max(lane, (int(tile_n) // lane) * lane)
    n_lanes = ((N + lane - 1) // lane) * lane
    tile_n = min(tile_n, n_lanes)
    n_pad = ((N + tile_n - 1) // tile_n) * tile_n
    grid_n = n_pad // tile_n

    # Lane-dense transposed (and zero-padded) input: batch on the lane axis.
    xt = jnp.zeros((p, n_pad), jnp.float32).at[:, :N].set(x.T.astype(jnp.float32))

    # Fold the per-feature scale into the first layer weight (transposed).
    w1t = (W[:, None] * W1).T.astype(jnp.float32)           # (hidden, p)
    b1c = b1.reshape(hidden, 1).astype(jnp.float32)          # (hidden, 1)

    # Stack output-layer weight with the skip projection: (1, hidden + p).
    wout = jnp.concatenate([W2[:, 0], theta]).reshape(1, hidden + p)
    wout = wout.astype(jnp.float32)
    b2s = b2.reshape(1).astype(jnp.float32)                  # scalar, via SMEM

    cost = pl.CostEstimate(
        flops=2 * n_pad * p * hidden + 2 * n_pad * (hidden + p),
        transcendentals=0,
        bytes_accessed=4 * (p * n_pad + n_pad + p * hidden + hidden
                            + (hidden + p) + 1),
    )

    out_t = pl.pallas_call(
        customnet_kernel,
        out_shape=jax.ShapeDtypeStruct((1, n_pad), jnp.float32),
        grid_spec=pltpu.PrefetchScalarGridSpec(
            num_scalar_prefetch=0,
            grid=(grid_n,),
            in_specs=[
                pl.BlockSpec((p, tile_n), lambda i: (0, i)),        # X^T tile
                pl.BlockSpec((hidden, p), lambda i: (0, 0)),        # folded W1^T
                pl.BlockSpec((hidden, 1), lambda i: (0, 0)),        # b1 column
                pl.BlockSpec((1, hidden + p), lambda i: (0, 0)),    # [W2^T|theta^T]
                pl.BlockSpec(memory_space=pltpu.MemorySpace.SMEM),  # b2 scalar
            ],
            out_specs=pl.BlockSpec((1, tile_n), lambda i: (0, i)),
        ),
        compiler_params=pltpu.CompilerParams(
            dimension_semantics=("parallel",),
            vmem_limit_bytes=32 * 1024 * 1024,
        ),
        cost_estimate=cost,
    )(xt, w1t, b1c, wout, b2s)

    return out_t[:, :N].T                                    # (N, 1)


def reference_forward(x, W, theta, W1, b1, W2, b2):
    x_scaled = x * W[None, :]
    h = jnp.maximum(x_scaled @ W1 + b1[None, :], 0.0)
    f_out = h @ W2 + b2[None, :]
    skip = x @ theta[:, None]
    return f_out + skip


if __name__ == "__main__":
    # Small shapes consistent with the module: p features, hidden_dims=(16,).
    # N is not a tile multiple on purpose (exercises padding + multi-tile grid).
    N, p, hidden = 1000, 8, 16

    key = jax.random.PRNGKey(0)
    kx, k1, k2, k3, k4 = jax.random.split(key, 5)

    x = jax.random.normal(kx, (N, p), dtype=jnp.float32)

    # Parameters (deterministic; W/theta non-trivial to exercise the folds).
    W = jnp.linspace(0.5, 1.5, p).astype(jnp.float32)
    theta = jnp.linspace(-1.0, 1.0, p).astype(jnp.float32)
    lim1 = 1.0 / jnp.sqrt(jnp.float32(p))
    W1 = jax.random.uniform(k1, (p, hidden), jnp.float32, -lim1, lim1)
    b1 = jax.random.uniform(k2, (hidden,), jnp.float32, -lim1, lim1)
    lim2 = 1.0 / jnp.sqrt(jnp.float32(hidden))
    W2 = jax.random.uniform(k3, (hidden, 1), jnp.float32, -lim2, lim2)
    b2 = jax.random.uniform(k4, (1,), jnp.float32, -lim2, lim2)

    out = customnet_forward(x, W, theta, W1, b1, W2, b2, tile_n=256)
    out = jax.block_until_ready(out)

    ref = reference_forward(x, W, theta, W1, b1, W2, b2)
    assert out.shape == (N, 1)
    assert jnp.allclose(out, ref, atol=1e-4, rtol=1e-4), "mismatch vs reference"

    print("KERNEL_OK")
</pallas_src>

<mosaic_0001>
module attributes {stable_mosaic.version = 11 : i64} {
  func.func @customnet_kernel(%arg0: i32, %arg1: memref<8x256xf32, #tpu.memory_space<vmem>>, %arg2: memref<16x8xf32, #tpu.memory_space<vmem>>, %arg3: memref<16x1xf32, #tpu.memory_space<vmem>>, %arg4: memref<1x24xf32, #tpu.memory_space<vmem>>, %arg5: memref<1xf32, #tpu.memory_space<smem>>, %arg6: memref<1x256xf32, #tpu.memory_space<vmem>>) attributes {dimension_semantics = [#tpu.dimension_semantics<parallel>], iteration_bounds = array<i64: 4>, scalar_prefetch = 0 : i64, scratch_operands = 0 : i64, tpu.core_type = #tpu.core_type<tc>, window_params = [{transform_indices = @transform_0, window_bounds = array<i64: 8, 256>}, {pipeline_mode = #tpu.pipeline_mode<synchronous>, transform_indices = @transform_1, window_bounds = array<i64: 16, 8>}, {pipeline_mode = #tpu.pipeline_mode<synchronous>, transform_indices = @transform_2, window_bounds = array<i64: 16, 1>}, {pipeline_mode = #tpu.pipeline_mode<synchronous>, transform_indices = @transform_3, window_bounds = array<i64: 1, 24>}, {transform_indices = @transform_4, window_bounds = array<i64: 1>}, {transform_indices = @transform_5, window_bounds = array<i64: 1, 256>}]} {
    %c0 = arith.constant 0 : index
    %c0_0 = arith.constant 0 : index
    %0 = vector.load %arg1[%c0, %c0_0] : memref<8x256xf32, #tpu.memory_space<vmem>>, vector<8x256xf32>
    %c0_1 = arith.constant 0 : index
    %c0_2 = arith.constant 0 : index
    %1 = vector.load %arg2[%c0_1, %c0_2] : memref<16x8xf32, #tpu.memory_space<vmem>>, vector<16x8xf32>
    %cst = arith.constant dense<0.000000e+00> : vector<16x256xf32>
    %2 = tpu.matmul %1, %0, %cst {dimension_numbers = #tpu.dot_dimension_numbers<[1], [0], [0], [1], [0, 0, 1, 1], [], []>} : vector<16x8xf32>, vector<8x256xf32>, vector<16x256xf32> -> vector<16x256xf32>
    %c0_3 = arith.constant 0 : index
    %c0_4 = arith.constant 0 : index
    %3 = vector.load %arg3[%c0_3, %c0_4] : memref<16x1xf32, #tpu.memory_space<vmem>>, vector<16x1xf32>
    %4 = vector.broadcast %3 : vector<16x1xf32> to vector<16x256xf32>
    %5 = arith.addf %2, %4 : vector<16x256xf32>
    %cst_5 = arith.constant 0.000000e+00 : f32
    %6 = vector.broadcast %cst_5 : f32 to vector<16x256xf32>
    %7 = arith.maximumf %5, %6 : vector<16x256xf32>
    %8 = tpu.concatenate %7, %0 in 0 : vector<16x256xf32>, vector<8x256xf32> -> vector<24x256xf32>
    %c0_6 = arith.constant 0 : index
    %c0_7 = arith.constant 0 : index
    %9 = vector.load %arg4[%c0_6, %c0_7] : memref<1x24xf32, #tpu.memory_space<vmem>>, vector<1x24xf32>
    %cst_8 = arith.constant dense<0.000000e+00> : vector<1x256xf32>
    %10 = tpu.matmul %9, %8, %cst_8 {dimension_numbers = #tpu.dot_dimension_numbers<[1], [0], [0], [1], [0, 0, 1, 1], [], []>} : vector<1x24xf32>, vector<24x256xf32>, vector<1x256xf32> -> vector<1x256xf32>
    %c0_9 = arith.constant 0 : index
    %11 = memref.load %arg5[%c0_9] : memref<1xf32, #tpu.memory_space<smem>>
    %12 = vector.broadcast %11 : f32 to vector<1x256xf32>
    %13 = arith.addf %10, %12 : vector<1x256xf32>
    %c0_10 = arith.constant 0 : index
    %c0_11 = arith.constant 0 : index
    %14 = vector.load %arg6[%c0_10, %c0_11] : memref<1x256xf32, #tpu.memory_space<vmem>>, vector<1x256xf32>
    tpu.vector_store %arg6[%c0_10, %c0_11], %13 {strides = array<i32>} : memref<1x256xf32, #tpu.memory_space<vmem>>, vector<1x256xf32>,
    return
  }
  func.func @transform_0(%arg0: i32) -> (i32, i32) {
    %c0_i32 = arith.constant 0 : i32
    %c0_i32_0 = arith.constant 0 : i32
    return %c0_i32, %arg0 : i32, i32
  }
  func.func @transform_1(%arg0: i32) -> (i32, i32) {
    %c0_i32 = arith.constant 0 : i32
    %c0_i32_0 = arith.constant 0 : i32
    %c0_i32_1 = arith.constant 0 : i32
    return %c0_i32, %c0_i32_0 : i32, i32
  }
  func.func @transform_2(%arg0: i32) -> (i32, i32) {
    %c0_i32 = arith.constant 0 : i32
    %c0_i32_0 = arith.constant 0 : i32
    %c0_i32_1 = arith.constant 0 : i32
    return %c0_i32, %c0_i32_0 : i32, i32
  }
  func.func @transform_3(%arg0: i32) -> (i32, i32) {
    %c0_i32 = arith.constant 0 : i32
    %c0_i32_0 = arith.constant 0 : i32
    %c0_i32_1 = arith.constant 0 : i32
    return %c0_i32, %c0_i32_0 : i32, i32
  }
  func.func @transform_4(%arg0: i32) -> i32 {
    %c0_i32 = arith.constant 0 : i32
    %c0_i32_0 = arith.constant 0 : i32
    return %c0_i32 : i32
  }
  func.func @transform_5(%arg0: i32) -> (i32, i32) {
    %c0_i32 = arith.constant 0 : i32
    %c0_i32_0 = arith.constant 0 : i32
    return %c0_i32, %arg0 : i32, i32
  }
}

</mosaic_0001>

<bundles_post_ra>
// kernel: tpu_custom_call.1
= control target key start
LH: loop header
LB: loop body
LE: loop exit
PB: predicated region body
PF: predicated region fallthrough
CT: control target
= control target key end

     0   :  { %s804_s0 = inlined_call_operand.hbm [shape: f32[8,1024], index: 0, kind: input, shape index: {}]   ;;  %s805_s1 = inlined_call_operand.vmem [shape: f32[16,8], index: 1, kind: input, shape index: {}]   ;;  %s806_s2 = inlined_call_operand.vmem [shape: f32[16,1], index: 2, kind: input, shape index: {}]   ;;  %s807_s3 = inlined_call_operand.vmem [shape: f32[1,24], index: 3, kind: input, shape index: {}]   ;;  %s808_s4 = inlined_call_operand.<no memory space> [shape: f32[1], index: 4, kind: input, shape index: {}]   ;;  %s809_s5 = inlined_call_operand.hbm [shape: f32[1,1024], index: 5, kind: output, shape index: {}]  }
   0x1   :  { %10 = sst [smem:[#allocation2]] %s808_s4 }
   0x2   :  { %11 = vsyncpa [#allocation4], 0 }
   0x3   :  { %13 = vsyncpa [#allocation4 + $0x1], 0 }
   0x4   :  { %14 = vsyncpa [#allocation5], 0 }
   0x5   :  { %16 = vsyncpa [#allocation5 + $0x1], 0  ;;  %s663_s20 = smov 0   ;;  %s665_s21 = smov 0  }
   0x6   :  { %s667_s22 = smov 0   ;;  %s669_s23 = smov 0  }
   0x7 LB: > { %s684_s4 = sadd.s32 4294967295, %s627_s23   ;;  %s463_s24 = sadd.s32 4294967294, %s627_s23   ;;  %s627_s23 = sphi %s669_s23, %s818_s23   ;;  %s623_s22 = sphi %s667_s22, %s817_s22   ;;  %s619_s21 = sphi %s665_s21, %s816_s21   ;;  %s615_s20 = sphi %s663_s20, %s815_s20  }
   0x8   : > { %s688_s25 = sadd.s32 1, %s627_s23   ;;  %s29_s26 = sadd.s32 1, %s623_s22 }
   0x9   : > { %s26_s27 = ssub.s32 %s627_s23, %s688_s25  ;;  %p36_p0 = scmp.ne.s32.totalorder %s623_s22, %s619_s21 }
   0xa   : > { %p27_p1 = scmp.eq.s32.totalorder %s26_s27, 0  ;;  %p37_p2 = scmp.eq.s32.totalorder %s627_s23, 0 }
   0xb   : > { %p42_p3 = scmp.ne.s32.totalorder %s619_s21, %s615_s20  ;;  %p43_p4 = scmp.eq.s32.totalorder %s684_s4, 0 }
   0xc   : > { %s700_s28 = scalar_select %p27_p1, %s623_s22, %s29_s26  }
   0xd   : > { %p702_p5 = por %p37_p2, %p36_p0  ;;  %p706_p6 = por %p43_p4, %p42_p3 }
   0xe   : > { %p150_p7 = scmp.eq.s32.totalorder %s684_s4, 3  ;;  %p156_p8 = scmp.eq.s32.totalorder %s463_s24, 3 }
   0xf   : > { %p495_p9 = scmp.lt.s32.totalorder %s627_s23, 4  ;;  %s188_s8 = sand.u32 1, %s623_s22  }
  0x10   : > { %p712_p10 = por %p150_p7, %p36_p0  ;;  %p716_p11 = por %p156_p8, %p42_p3 }
  0x11   : > { %s482_s9 = sshll.u32 %s627_s23, 4  ;;  %s466_s10 = sshll.u32 %s188_s8, 4 }
  0x12   : > { %s197_s13 = scalar_lea.hbm %s804_s0, %s482_s9  ;;  %s192_s15 = scalar_lea.vmem [#allocation3], %s466_s10 }
  0x13   : > { %s199_s14 = sshll.u32 %s197_s13, 4  ;;  %s201_s16 = sshll.u32 %s192_s15, 4  ;;  %s200_s14 = int_to_ptr.hbm [resolvable:$true] %s199_s14  ;;  %s202_s16 = int_to_ptr.vmem [resolvable:$true] %s201_s16 }
  0x14   : > { %p727_p12 = pnand %p495_p9, %p702_p5  ;;  %p469_p13 = scmp.ge.s32.totalorder %s627_s23, 1 }
  0x15   : > { %p206_p0 = scmp.lt.s32.totalorder %s627_s23, 5  ;;  %s189_s18 = scalar_lea.sflag [#allocation4], %s188_s8 }
  0x16   : > { %s531_s19 = sshra.s32 %s200_s14, 4  ;;  %p535_p2 = pneg %p727_p12  ;;  %s532_s19 = int_to_ptr.hbm [resolvable:$true] %s531_s19 }
  0x17   : > { %s533_s24 = scalar_lea.hbm %s532_s19, 16  ;;  %s538_s29 = scalar_lea.hbm %s804_s0, 64 }
  0x18   : > { %p534_p1 = scmp.ne.s32.totalorder %s532_s19, %s533_s24  ;;  %p539_p5 = scmp.lt.s32.totalorder %s532_s19, %s804_s0 }
  0x19   : > { %p540_p7 = scmp.lt.s32.totalorder %s538_s29, %s533_s24 }
  0x1a   : > { %p536_p3 = pnand %p535_p2, %p534_p1 }
  0x1b   : > { %p541_p8 = por %p540_p7, %p539_p5 }
  0x1c   : > { %p537_p4 = pneg %p536_p3 }
  0x1e   : > { %p542_p9 = pnand %p541_p8, %p537_p4 }
  0x20   : > { %545 = shalt.err (!%p542_p9)
}
  0x21   : > { %490 = dma.hbm_to_vmem [thread:$0]  (!%p727_p12), %s200_s14, 256, %s202_s16, %s189_s18  }
  0x22   : > { %p207_p1 = pnand %p469_p13, %p206_p0 }
  0x23   : > { %s748_s8 = sand.u32 (!%p207_p1), 1, %s619_s21  }
  0x24   : > { %210 = sbr.rel (%p207_p1) target bundleno = 326 (0x146), region = 40  ;;  %s470_s11 = sshll.u32 (!%p207_p1), %s748_s8, 4 }
  0x25   : > { %s213_s12 = scalar_lea.sflag (!%p207_p1), [#allocation4], %s748_s8  ;;  %s216_s13 = scalar_lea.vmem (!%p207_p1), [#allocation3], %s470_s11 }
  0x29   : > { %606 = dma.done.wait (%p706_p6), %s213_s12, 256  }
  0x2a   : > { %608 = vsyncadd (%p706_p6), %s213_s12, 4294967040  ;;  %v629_v0 = vmov 0   ;;  %vm262_vm0 = vcmask 64512   ;;  %v246_v1 = vld [vmem:[%s216_s13] sm:$0xff]  ;;  %v247_v2 = vld [vmem:[%s216_s13 + $0x8] sm:$0xff]  ;;  %vm322_vm1 = vcmask 195584   ;;  %v372_v23 = vlaneseq }
  0x2b   : > { %530 = vset.pattern.permute.xlu0 %v629_v0  ;;  %v248_v3 = vld [vmem:[%s805_s1] sm:$0xff]  ;;  %284 = vmatpush.msra.mxu0 %v246_v1  ;;  %v251_v4 = vld [vmem:[%s806_s2 + $0x8] sm:$0xff]  ;;  %s320_s29 = sld [smem:[#allocation2]]  ;;  %s471_s9 = sshll.u32 %s748_s8, 1  ;;  %vm369_vm2 = vcmask 1040384  }
  0x2c   : > { %307 = vmatpush.msra.mxu1 %v247_v2  ;;  %472 = vmatmul.msk.f32.vlgmr.msra.gmra.mxu0 %vm262_vm0, %v248_v3  ;;  %v249_v5 = vld [vmem:[%s805_s1 + $0x8] sm:$0xff]  ;;  %v250_v6 = vld [vmem:[%s806_s2] sm:$0xff]  ;;  %s479_s10 = sshll.u32 %s684_s4, 1  ;;  %s243_s14 = scalar_lea.vmem [#allocation6], %s471_s9  ;;  %vm374_vm3 = vcmp.lt.s32.totalorder %v372_v23, 256 }
  0x2d   : > { %474 = vmatmul.msk.f32.vlgmr.msra.gmra.mxu1 %vm262_vm0, %v248_v3  ;;  %259 = vperm.xlu0 %530, %v251_v4   ;;  %v319_v21 = vld [vmem:[%s807_s3] sm:$0x1]  ;;  %s388_s13 = scalar_lea.hbm %s809_s5, %s479_s10  ;;  %s390_s15 = sshll.u32 %s243_s14, 4  ;;  %s391_s15 = int_to_ptr.vmem [resolvable:$true] %s390_s15 }
  0x2e   : > { %339 = vmatpush.msra.mxu2 %v246_v1  ;;  %359 = vmatpush.msra.mxu3 %v247_v2  ;;  %s392_s16 = sshll.u32 %s388_s13, 4  ;;  %s378_s4 = scalar_lea.sflag [#allocation5], %s748_s8  ;;  %s393_s16 = int_to_ptr.hbm [resolvable:$true] %s392_s16 }
  0x2f   : > { %s575_s17 = sshra.s32 %s393_s16, 4  ;;  %s581_s24 = scalar_lea.hbm %s809_s5, 8  ;;  %s576_s17 = int_to_ptr.hbm [resolvable:$true] %s575_s17 }
  0x30   : > { %s577_s30 = scalar_lea.hbm %s576_s17, 2  ;;  %p582_p0 = scmp.lt.s32.totalorder %s576_s17, %s809_s5 }
  0x31   : > { %v321_v22 = vstv %s320_s29  ;;  %p578_p6 = scmp.ne.s32.totalorder %s576_s17, %s577_s30  ;;  %p583_p2 = scmp.lt.s32.totalorder %s581_s24, %s577_s30 }
  0x33   : > { %p579_p12 = pnand %p578_p6, %p712_p10  ;;  %p584_p3 = por %p583_p2, %p582_p0 }
  0x34   : > { %473 = vmatmul.msk.f32.gmra.mxu0 %vm262_vm0, %v249_v5 }
  0x35   : > { %475 = vmatmul.msk.f32.gmra.mxu1 %vm262_vm0, %v249_v5  ;;  %254 = vperm.xlu0 %530, %v250_v6   ;;  %p580_p13 = pneg %p579_p12 }
  0x37   : > { %p585_p4 = pnand %p584_p3, %p580_p13 }
  0x9f   : > { %v260_v7 = vpop.permute.xlu0 %259 }
  0xa7   : > { %v255_v10 = vpop.permute.xlu0 %254 }
  0xa9   : > { %v286_v8 = vpop.f32.mrf.mxu0 }
  0xaa   : > { %v309_v9 = vpop.f32.mrf.mxu1  ;;  %v287_v13 = vadd.f32 %v286_v8, %v255_v10 }
  0xab   : > { %v310_v14 = vadd.f32 %v309_v9, %v255_v10 }
  0xac   : > { %v315_v19 = vmax.f32 %v287_v13, 0.0 }
  0xad   : > { %v316_v20 = vmax.f32 %v310_v14, 0.0 }
  0xb1   : > { %v289_v11 = vpop.f32.mrf.mxu0 }
  0xb2   : > { %v312_v12 = vpop.f32.mrf.mxu1  ;;  %v290_v15 = vadd.f32 %v289_v11, %v260_v7 }
  0xb3   : > { %v313_v16 = vadd.f32 %v312_v12, %v260_v7 }
  0xb4   : > { %v317_v17 = vmax.f32 %v290_v15, 0.0 }
  0xb5   : > { %v318_v18 = vmax.f32 %v313_v16, 0.0 }
  0xb6   : > { %340 = vmatpush.msra.mxu2 %v317_v17 }
  0xb7   : > { %360 = vmatpush.msra.mxu3 %v318_v18 }
  0xb8   : > { %341 = vmatpush.msra.mxu2 %v315_v19 }
  0xb9   : > { %361 = vmatpush.msra.mxu3 %v316_v20  ;;  %476 = vmatmul.msk.f32.vlgmr.msra.gmra.mxu2 %vm322_vm1, %v319_v21 }
  0xba   : > { %477 = vmatmul.msk.f32.vlgmr.msra.gmra.mxu3 %vm322_vm1, %v319_v21 }
 0x13c   : > { %v343_v25 = vpop.f32.mrf.mxu2 }
 0x13d   : > { %v363_v24 = vpop.f32.mrf.mxu3  ;;  %v344_v27 = vadd.f32 %v343_v25, %v321_v22 }
 0x13e   : > { %v364_v26 = vadd.f32 %v363_v24, %v321_v22 }
 0x140   : > { %v368_v28 = vrot.slane %v364_v26, 7 }
 0x142   : > { %v370_v29 = vsel %vm369_vm2, %v344_v27, %v368_v28 }
 0x143   : > { %376 = vst.msk [vmem:[%s243_s14] sm:$0x3] %vm374_vm3, %v370_v29 }
 0x144   : > { %588 = shalt.err (!%p585_p4)
}
 0x145   : > { %485 = dma.vmem_to_hbm [thread:$0]  (%p712_p10), %s391_s15, 32, %s393_s16, %s378_s4  }
 0x146 PF: > { %p496_p5 = scmp.ge.s32.totalorder %s627_s23, 2  ;;  %s404_s8 = sand.u32 1, %s615_s20  }
 0x147   : > { %s405_s29 = scalar_lea.sflag [#allocation5], %s404_s8 }
 0x148   : > { %p492_p7 = pnand %p496_p5, %p716_p11 }
 0x14a   : > { %p493_p8 = pneg %p492_p7 }
 0x14c   : > { %610 = dma.done.wait (%p493_p8), %s405_s29, 32  }
 0x14d   : > { %612 = vsyncadd (%p493_p8), %s405_s29, 4294967264  ;;  %p19_p9 = scmp.ge.s32.totalorder %s688_s25, 6   ;;  %s815_s20 = smov %s619_s21 }
 0x14e   : > { %s816_s21 = smov %s623_s22  ;;  %s817_s22 = smov %s700_s28 }
 0x14f   : > { %s818_s23 = smov %s688_s25  ;;  %21 = sbr.rel (!%p19_p9) target bundleno = 7 (0x7), region = 85 }
 0x154   :  { %411 = vsyncpa [#allocation4], 1 }
 0x155   :  { %413 = vsyncpa [#allocation4 + $0x1], 1 }
 0x156   :  { %414 = vsyncpa [#allocation5], 1 }
 0x157   :  { %416 = vsyncpa [#allocation5 + $0x1], 1 }

</bundles_post_ra>
